<compile_context>
chip_gen: v7x
topology: tpu7x:2x2x1
jax: 0.10.0
libtpu: 0.0.40
codegen_flags: <defaults>
</compile_context>

<pallas_src>
import jax
import jax.numpy as jnp
from jax.experimental import pallas as pl
from jax.experimental.pallas import tpu as pltpu


def _conv_bn_relu_kernel(x_ref, w_ref, b_ref, o_ref):
    """Fused conv + folded-BN + ReLU on a (rows, lanes) layout.

    x_ref: (Hp, W*Cin)           H-padded input slab of one batch element
    w_ref: (KH, W*Cin, Wo*Cout)  banded weight (KW taps, W window, W-pad, BN scale folded)
    b_ref: (1, Wo*Cout)          folded BN bias, tiled per output column
    o_ref: (TH, Wo*Cout)         output row tile (lane-dense)
    """
    kh_taps = w_ref.shape[0]
    th = o_ref.shape[0]
    h0 = pl.program_id(1) * th

    acc = jnp.zeros(o_ref.shape, jnp.float32)
    for kh in range(kh_taps):  # static unroll; KH is small (3)
        rows = x_ref[pl.ds(h0 + kh, th), :]  # (TH, W*Cin), contiguous full-lane rows
        acc = acc + jnp.dot(rows, w_ref[kh], preferred_element_type=jnp.float32)

    y = jnp.maximum(acc + b_ref[...], 0.0)
    o_ref[...] = y.astype(o_ref.dtype)


def basic_conv2d(x_nchw, weight, gamma, beta, running_mean, running_var,
                 *, padding=1, eps=1e-3, row_tile=8):
    """BasicConv2d forward (stride=1). x_nchw: (N, Cin, H, W); weight: (Cout, Cin, KH, KW)."""
    # TODO(synk): stride > 1 / dilation / groups of nn.Conv2d are not implemented
    # (stride could be folded into the band matrix and the row slicing).
    N, Cin, H, W = x_nchw.shape
    Cout, _, KH, KW = weight.shape
    Ho = H + 2 * padding - KH + 1
    Wo = W + 2 * padding - KW + 1
    Hp = H + 2 * padding

    # --- fold BatchNorm (inference / running-stats form) into weights + bias row ---
    scale = gamma * jax.lax.rsqrt(running_var + eps)             # (Cout,)
    bias = beta - running_mean * scale                           # (Cout,)
    w_hwio = jnp.transpose(weight, (2, 3, 1, 0))                 # (KH, KW, Cin, Cout)
    w_scaled = w_hwio * scale                                    # BN scale folded in

    # --- banded weight: fold KW taps + W sliding window (+ W zero-padding) into K ---
    # big_w[kh, wi*Cin + ci, w*Cout + co] = w_scaled[kh, wi - w + padding, ci, co]
    #                                       if 0 <= wi - w + padding < KW else 0
    onehot = (jnp.arange(W)[None, :, None]
              == (jnp.arange(Wo)[None, None, :]
                  + jnp.arange(KW)[:, None, None] - padding)).astype(w_scaled.dtype)
    big_w = jnp.einsum('kxw,hkio->hxiwo', onehot, w_scaled)
    big_w = big_w.reshape(KH, W * Cin, Wo * Cout)

    bias_row = jnp.tile(bias, Wo).reshape(1, Wo * Cout)

    # --- input layout: NCHW -> (N, Hp, W*Cin); only the tiny H halo is padded,
    #     fused into the same layout-transform pass as the transpose. ---
    x_nhwc = jnp.transpose(x_nchw, (0, 2, 3, 1))
    x_flat = jnp.pad(x_nhwc, ((0, 0), (padding, padding), (0, 0), (0, 0)))
    x_flat = x_flat.reshape(N, Hp, W * Cin)

    # Output row tile: second-to-last block dim must be a multiple of 8 or the full dim.
    if Ho % row_tile == 0 and row_tile % 8 == 0:
        th = row_tile
    else:
        th = Ho
    grid = (N, Ho // th)

    out_flat = pl.pallas_call(
        _conv_bn_relu_kernel,
        out_shape=jax.ShapeDtypeStruct((N, Ho, Wo * Cout), x_nchw.dtype),
        grid_spec=pltpu.PrefetchScalarGridSpec(
            num_scalar_prefetch=0,
            grid=grid,
            in_specs=[
                # Full padded-H slab of batch element n (re-used across h-tiles).
                pl.BlockSpec((None, Hp, W * Cin), lambda n, h: (n, 0, 0)),
                # Banded weights + bias: resident, same block every step.
                pl.BlockSpec((KH, W * Cin, Wo * Cout), lambda n, h: (0, 0, 0)),
                pl.BlockSpec((1, Wo * Cout), lambda n, h: (0, 0)),
            ],
            out_specs=pl.BlockSpec((None, th, Wo * Cout), lambda n, h: (n, h, 0)),
        ),
        compiler_params=pltpu.CompilerParams(
            dimension_semantics=("parallel", "parallel")),
    )(x_flat, big_w, bias_row)

    out_nhwc = out_flat.reshape(N, Ho, Wo, Cout)
    return jnp.transpose(out_nhwc, (0, 3, 1, 2))                 # back to NCHW


def _reference(x_nchw, weight, gamma, beta, running_mean, running_var,
               *, padding=1, eps=1e-3):
    """Pure-JAX reference (lax conv + BN + ReLU) for correctness check."""
    y = jax.lax.conv_general_dilated(
        x_nchw, weight, window_strides=(1, 1),
        padding=((padding, padding), (padding, padding)),
        dimension_numbers=("NCHW", "OIHW", "NCHW"))
    scale = gamma / jnp.sqrt(running_var + eps)
    bias = beta - running_mean * scale
    y = y * scale[None, :, None, None] + bias[None, :, None, None]
    return jnp.maximum(y, 0.0)


if __name__ == "__main__":
    key = jax.random.PRNGKey(0)
    k_x, k_w, k_g, k_b, k_m, k_v = jax.random.split(key, 6)

    # BasicConv2d(in_channels=4, out_channels=8, kernel_size=3, padding=1)
    # applied to a (2, 4, 16, 16) NCHW input.
    N, Cin, H, W = 2, 4, 16, 16
    Cout, KH, KW = 8, 3, 3

    x = jax.random.normal(k_x, (N, Cin, H, W), jnp.float32)
    weight = jax.random.normal(k_w, (Cout, Cin, KH, KW), jnp.float32) * 0.1
    gamma = jax.random.normal(k_g, (Cout,), jnp.float32) * 0.1 + 1.0
    beta = jax.random.normal(k_b, (Cout,), jnp.float32) * 0.1
    running_mean = jax.random.normal(k_m, (Cout,), jnp.float32) * 0.1
    running_var = jax.nn.softplus(jax.random.normal(k_v, (Cout,), jnp.float32)) + 0.5

    out = basic_conv2d(x, weight, gamma, beta, running_mean, running_var)
    out = jax.block_until_ready(out)

    ref = _reference(x, weight, gamma, beta, running_mean, running_var)
    assert out.shape == (N, Cout, H, W)
    assert jnp.allclose(out, ref, atol=1e-4, rtol=1e-4)

    print("KERNEL_OK")
</pallas_src>

<mosaic_0001>
module attributes {stable_mosaic.version = 11 : i64} {
  func.func @_conv_bn_relu_kernel(%arg0: i32, %arg1: i32, %arg2: memref<1x18x64xf32, #tpu.memory_space<vmem>>, %arg3: memref<3x64x128xf32, #tpu.memory_space<vmem>>, %arg4: memref<1x128xf32, #tpu.memory_space<vmem>>, %arg5: memref<1x8x128xf32, #tpu.memory_space<vmem>>) attributes {dimension_semantics = [#tpu.dimension_semantics<parallel>, #tpu.dimension_semantics<parallel>], iteration_bounds = array<i64: 2, 2>, scalar_prefetch = 0 : i64, scratch_operands = 0 : i64, tpu.core_type = #tpu.core_type<tc>, window_params = [{transform_indices = @transform_0, window_bounds = array<i64: 1, 18, 64>}, {pipeline_mode = #tpu.pipeline_mode<synchronous>, transform_indices = @transform_1, window_bounds = array<i64: 3, 64, 128>}, {pipeline_mode = #tpu.pipeline_mode<synchronous>, transform_indices = @transform_2, window_bounds = array<i64: 1, 128>}, {transform_indices = @transform_3, window_bounds = array<i64: 1, 8, 128>}]} {
    %c8_i32 = arith.constant 8 : i32
    %0 = arith.muli %arg1, %c8_i32 : i32
    %cst = arith.constant 0.000000e+00 : f32
    %1 = vector.broadcast %cst : f32 to vector<8x128xf32>
    %c0_i32 = arith.constant 0 : i32
    %2 = arith.addi %0, %c0_i32 : i32
    %c0 = arith.constant 0 : index
    %3 = arith.index_cast %2 : i32 to index
    %c0_0 = arith.constant 0 : index
    %4 = vector.load %arg2[%c0, %3, %c0_0] : memref<1x18x64xf32, #tpu.memory_space<vmem>>, vector<1x8x64xf32>
    %5 = vector.shape_cast %4 : vector<1x8x64xf32> to vector<8x64xf32>
    %c0_1 = arith.constant 0 : index
    %c0_2 = arith.constant 0 : index
    %c0_3 = arith.constant 0 : index
    %6 = vector.load %arg3[%c0_1, %c0_2, %c0_3] : memref<3x64x128xf32, #tpu.memory_space<vmem>>, vector<1x64x128xf32>
    %7 = vector.shape_cast %6 : vector<1x64x128xf32> to vector<64x128xf32>
    %cst_4 = arith.constant dense<0.000000e+00> : vector<8x128xf32>
    %8 = tpu.matmul %5, %7, %cst_4 {dimension_numbers = #tpu.dot_dimension_numbers<[1], [0], [0], [1], [0, 0, 1, 1], [], []>} : vector<8x64xf32>, vector<64x128xf32>, vector<8x128xf32> -> vector<8x128xf32>
    %9 = arith.addf %1, %8 : vector<8x128xf32>
    %c1_i32 = arith.constant 1 : i32
    %10 = arith.addi %0, %c1_i32 : i32
    %c0_5 = arith.constant 0 : index
    %11 = arith.index_cast %10 : i32 to index
    %c0_6 = arith.constant 0 : index
    %12 = vector.load %arg2[%c0_5, %11, %c0_6] : memref<1x18x64xf32, #tpu.memory_space<vmem>>, vector<1x8x64xf32>
    %13 = vector.shape_cast %12 : vector<1x8x64xf32> to vector<8x64xf32>
    %c1 = arith.constant 1 : index
    %c0_7 = arith.constant 0 : index
    %c0_8 = arith.constant 0 : index
    %14 = vector.load %arg3[%c1, %c0_7, %c0_8] : memref<3x64x128xf32, #tpu.memory_space<vmem>>, vector<1x64x128xf32>
    %15 = vector.shape_cast %14 : vector<1x64x128xf32> to vector<64x128xf32>
    %cst_9 = arith.constant dense<0.000000e+00> : vector<8x128xf32>
    %16 = tpu.matmul %13, %15, %cst_9 {dimension_numbers = #tpu.dot_dimension_numbers<[1], [0], [0], [1], [0, 0, 1, 1], [], []>} : vector<8x64xf32>, vector<64x128xf32>, vector<8x128xf32> -> vector<8x128xf32>
    %17 = arith.addf %9, %16 : vector<8x128xf32>
    %c2_i32 = arith.constant 2 : i32
    %18 = arith.addi %0, %c2_i32 : i32
    %c0_10 = arith.constant 0 : index
    %19 = arith.index_cast %18 : i32 to index
    %c0_11 = arith.constant 0 : index
    %20 = vector.load %arg2[%c0_10, %19, %c0_11] : memref<1x18x64xf32, #tpu.memory_space<vmem>>, vector<1x8x64xf32>
    %21 = vector.shape_cast %20 : vector<1x8x64xf32> to vector<8x64xf32>
    %c2 = arith.constant 2 : index
    %c0_12 = arith.constant 0 : index
    %c0_13 = arith.constant 0 : index
    %22 = vector.load %arg3[%c2, %c0_12, %c0_13] : memref<3x64x128xf32, #tpu.memory_space<vmem>>, vector<1x64x128xf32>
    %23 = vector.shape_cast %22 : vector<1x64x128xf32> to vector<64x128xf32>
    %cst_14 = arith.constant dense<0.000000e+00> : vector<8x128xf32>
    %24 = tpu.matmul %21, %23, %cst_14 {dimension_numbers = #tpu.dot_dimension_numbers<[1], [0], [0], [1], [0, 0, 1, 1], [], []>} : vector<8x64xf32>, vector<64x128xf32>, vector<8x128xf32> -> vector<8x128xf32>
    %25 = arith.addf %17, %24 : vector<8x128xf32>
    %c0_15 = arith.constant 0 : index
    %c0_16 = arith.constant 0 : index
    %26 = vector.load %arg4[%c0_15, %c0_16] : memref<1x128xf32, #tpu.memory_space<vmem>>, vector<1x128xf32>
    %27 = vector.broadcast %26 : vector<1x128xf32> to vector<8x128xf32>
    %28 = arith.addf %25, %27 : vector<8x128xf32>
    %cst_17 = arith.constant 0.000000e+00 : f32
    %29 = vector.broadcast %cst_17 : f32 to vector<8x128xf32>
    %30 = arith.maximumf %28, %29 : vector<8x128xf32>
    %c0_18 = arith.constant 0 : index
    %c0_19 = arith.constant 0 : index
    %c0_20 = arith.constant 0 : index
    %31 = vector.load %arg5[%c0_18, %c0_19, %c0_20] : memref<1x8x128xf32, #tpu.memory_space<vmem>>, vector<1x8x128xf32>
    %32 = vector.shape_cast %31 : vector<1x8x128xf32> to vector<8x128xf32>
    %33 = vector.shape_cast %30 : vector<8x128xf32> to vector<1x8x128xf32>
    tpu.vector_store %arg5[%c0_18, %c0_19, %c0_20], %33 {strides = array<i32>} : memref<1x8x128xf32, #tpu.memory_space<vmem>>, vector<1x8x128xf32>,
    return
  }
  func.func @transform_0(%arg0: i32, %arg1: i32) -> (i32, i32, i32) {
    %c0_i32 = arith.constant 0 : i32
    %c0_i32_0 = arith.constant 0 : i32
    %c0_i32_1 = arith.constant 0 : i32
    return %arg0, %c0_i32, %c0_i32_0 : i32, i32, i32
  }
  func.func @transform_1(%arg0: i32, %arg1: i32) -> (i32, i32, i32) {
    %c0_i32 = arith.constant 0 : i32
    %c0_i32_0 = arith.constant 0 : i32
    %c0_i32_1 = arith.constant 0 : i32
    %c0_i32_2 = arith.constant 0 : i32
    return %c0_i32, %c0_i32_0, %c0_i32_1 : i32, i32, i32
  }
  func.func @transform_2(%arg0: i32, %arg1: i32) -> (i32, i32) {
    %c0_i32 = arith.constant 0 : i32
    %c0_i32_0 = arith.constant 0 : i32
    %c0_i32_1 = arith.constant 0 : i32
    return %c0_i32, %c0_i32_0 : i32, i32
  }
  func.func @transform_3(%arg0: i32, %arg1: i32) -> (i32, i32, i32) {
    %c0_i32 = arith.constant 0 : i32
    %c0_i32_0 = arith.constant 0 : i32
    return %arg0, %arg1, %c0_i32 : i32, i32, i32
  }
}

</mosaic_0001>

<bundles_post_ra>
// kernel: tpu_custom_call.1
= control target key start
LH: loop header
LB: loop body
LE: loop exit
PB: predicated region body
PF: predicated region fallthrough
CT: control target
= control target key end

     0   :  { %8 = vsyncpa [#allocation3], 0  ;;  %s1156_s0 = inlined_call_operand.vmem [shape: f32[2,18,64], index: 0, kind: input, shape index: {}]   ;;  %s1157_s1 = inlined_call_operand.hbm [shape: f32[3,64,128], index: 1, kind: input, shape index: {}]   ;;  %s1158_s2 = inlined_call_operand.vmem [shape: f32[1,128], index: 2, kind: input, shape index: {}]   ;;  %s1159_s3 = inlined_call_operand.hbm [shape: f32[2,16,128], index: 3, kind: output, shape index: {}]  }
   0x1   :  { %9 = vsyncpa [#allocation4], 0 }
   0x2   :  { %11 = vsyncpa [#allocation4 + $0x1], 0  ;;  %s958_s12 = smov 0   ;;  %s960_s13 = smov 0  }
   0x3   :  { %s962_s14 = smov 0   ;;  %s964_s15 = smov 0  }
   0x4   :  { %s966_s16 = smov 0   ;;  %s968_s17 = smov 0  }
   0x5   :  { %s970_s18 = smov 0   ;;  %s972_s19 = smov 0  }
   0x6 LB: > { %s572_s20 = sadd.s32 4294967295, %s929_s19   ;;  %s573_s21 = sadd.s32 4294967294, %s929_s19   ;;  %s929_s19 = sphi %s972_s19, %s17_s19   ;;  %s925_s18 = sphi %s970_s18, %s1179_s18   ;;  %s921_s17 = sphi %s968_s17, %s1178_s17   ;;  %s917_s16 = sphi %s966_s16, %s1177_s16   ;;  %s913_s15 = sphi %s964_s15, %s1176_s15   ;;  %s909_s14 = sphi %s962_s14, %s1175_s14   ;;  %s905_s13 = sphi %s960_s13, %s1174_s13   ;;  %s901_s12 = sphi %s958_s12, %s1173_s12  }
   0x7   : > { %s26_s22 = sadd.s32 1, %s921_s17  ;;  %s29_s23 = sadd.s32 1, %s925_s18 }
   0x8   : > { %p27_p0 = scmp.ge.s32.totalorder %s26_s22, 2  ;;  %s106_s24 = sadd.s32 1, %s909_s14 }
   0x9   : > { %p116_p1 = scmp.ne.s32.totalorder %s909_s14, %s905_s13  ;;  %p117_p2 = scmp.eq.s32.totalorder %s572_s20, 3 }
   0xa   : > { %s1181_s22 = smov (%p27_p0, %s26_s22), 0  ;;  %s1183_s23 = smov (!%p27_p0, %s29_s23), %s925_s18 }
   0xb   : > { %s102_s25 = ssub.s32 %s921_s17, %s1181_s22  ;;  %p1010_p3 = por %p117_p2, %p116_p1 }
   0xc   : > { %p31_p4 = scmp.ge.s32.totalorder %s1183_s23, 2  ;;  %p122_p5 = scmp.ne.s32.totalorder %s905_s13, %s901_s12 }
   0xd   : > { %s1164_s26 = scalar_select %p1010_p3, 1, 0 }
   0xe   : > { %p123_p6 = scmp.eq.s32.totalorder %s573_s21, 3  ;;  %p574_p7 = scmp.ge.s32.totalorder %s929_s19, 1 }
   0xf   : > { %s1185_s23 = smov (%p31_p4, %s1183_s23), 0  ;;  %p130_p9 = scmp.lt.s32.totalorder %s929_s19, 5 }
  0x10   : > { %p1019_p8 = por %p123_p6, %p122_p5  ;;  %s101_s28 = ssub.s32 %s925_s18, %s1185_s23 }
  0x11   : > { %s103_s29 = sor.u32 %s102_s25, %s101_s28  ;;  %p1026_p10 = pnand %p574_p7, %p130_p9 }
  0x12   : > { %s1165_s27 = scalar_select %p1019_p8, 1, 0 }
  0x13   : > { %s1166_s30 = scalar_select %p1026_p10, 1, 0 }
  0x14   : > { %p104_p11 = scmp.eq.s32.totalorder %s103_s29, 0  ;;  %p1030_p12 = scmp.eq.s32.totalorder %s572_s20, 0 }
  0x15   : > { %p722_p13 = pneg %p1026_p10  ;;  %s931_s6 = smov [#allocation2]  }
  0x16   : > { %s1167_s4 = scalar_select %p1030_p12, 1, 0 }
  0x17   : > { %s1037_s5 = scalar_select %p104_p11, %s909_s14, %s106_s24  }
  0x18   : > { %s142_s7 = sshll.u32 %s931_s6, 4  ;;  %p1041_p0 = pnand %p1030_p12, %p722_p13  ;;  %s143_s7 = int_to_ptr.vmem [resolvable:$true] %s142_s7 }
  0x19   : > { %s803_s11 = scalar_lea.hbm %s1157_s1, 3072 }
  0x1a   : > { %p804_p1 = scmp.ne.s32.totalorder %s1157_s1, %s803_s11  ;;  %p805_p2 = pneg %p1041_p0 }
  0x1b   : > { %p810_p6 = scmp.lt.u32.totalorder %s803_s11, %s1157_s1 }
  0x1c   : > { %p806_p4 = pnand %p805_p2, %p804_p1 }
  0x1e   : > { %p807_p5 = pneg %p806_p4 }
  0x20   : > { %p812_p7 = pnand %p810_p6, %p807_p5 }
  0x22   : > { %815 = shalt.err (!%p812_p7)
}
  0x23   : > { %s816_s28 = scalar_lea.vmem %s143_s7, 3072  ;;  %p824_p8 = scmp.lt.s32.totalorder %s143_s7, %s143_s7 }
  0x24   : > { %p817_p9 = scmp.ne.s32.totalorder %s143_s7, %s816_s28  ;;  %p825_p3 = scmp.lt.s32.totalorder %s816_s28, %s816_s28 }
  0x26   : > { %p819_p11 = pnand %p817_p9, %p805_p2  ;;  %p826_p12 = por %p825_p3, %p824_p8 }
  0x28   : > { %p820_p13 = pneg %p819_p11 }
  0x2a   : > { %p827_p10 = pnand %p826_p12, %p820_p13 }
  0x2c   : > { %830 = shalt.err (!%p827_p10)
}
  0x2d   : > { %s932_s29 = smov 128   ;;  %s933_s6 = smov 8  }
  0x2e   : > { %725 = dma.hbm_to_vmem [thread:$0]  (!%p1041_p0), %s1157_s1, 3072, %s143_s7, [#allocation3], %s932_s29, %s932_s29, %s933_s6  }
  0x2f   : > { %p1169_p1 = scmp.ne.s32.totalorder %s1166_s30, 0 }
  0x30   : > { %p1170_p4 = scmp.ne.s32.totalorder (!%p1169_p1), %s1167_s4, 0 }
  0x31   : > { %169 = sbr.rel (%p1169_p1) target bundleno = 324 (0x144), region = 32 }
  0x38   : > { %892 = dma.done.wait (%p1170_p4), [#allocation3], 3072  }
  0x39   : > { %894 = vsyncadd (%p1170_p4), [#allocation3], 4294964224  ;;  %v934_v0 = vmov 0.0|0.0   ;;  %vm935_vm0 = vmmov 0   ;;  %v936_v1 = vmov 0.0   ;;  %p193_p3 = scmp.lt.s32.totalorder %s917_s16, 1 }
  0x3a   : > { %679 = vmatprep.subr.bf16.mxu0 %v934_v0  ;;  %691 = vmatprep.subr.bf16.mxu1 %v934_v0  ;;  %v213_v2 = vld [vmem:[#allocation2 + $0x40] sm:$0xff]  ;;  %v214_v3 = vld [vmem:[#allocation2 + $0x48] sm:$0xff]  ;;  %v215_v7 = vld [vmem:[#allocation2 + $0x50] sm:$0xff]  ;;  %s581_s20 = sshll.u32 %s913_s15, 3  ;;  %vm221_vm1 = vcmask 523264   ;;  %s190_s24 = sand.u32 1, %s905_s13  }
  0x3b   : > { %638 = vmatprep.mubr.msk.f32.mxu0 %vm935_vm0, %v936_v1  ;;  %657 = vmatprep.mubr.msk.f32.mxu1 %vm935_vm0, %v936_v1  ;;  %v201_v4 = vld [vmem:[#allocation2] sm:$0xff]  ;;  %v680_v5 = vpack.c.bf16 %v214_v3, %v213_v2  ;;  %v202_v6 = vld [vmem:[#allocation2 + $0x8] sm:$0xff]  ;;  %v216_v8 = vld [vmem:[#allocation2 + $0x58] sm:$0xff]  ;;  %s194_s30 = scalar_select %p193_p3, %s917_s16, 1 }
  0x3c   : > { %v692_v9 = vpack.c.bf16 %v202_v6, %v201_v4  ;;  %v203_v10 = vld [vmem:[#allocation2 + $0x10] sm:$0xff]  ;;  %v204_v11 = vld [vmem:[#allocation2 + $0x18] sm:$0xff]  ;;  %v683_v12 = vpack.c.bf16 %v216_v8, %v215_v7  ;;  %v217_v14 = vld [vmem:[#allocation2 + $0x60] sm:$0xff]  ;;  %s579_s25 = sshll.u32 %s190_s24, 3  ;;  %s591_s28 = sshll.u32 %s917_s16, 1 }
  0x3d   : > { %681 = vmatpush3.bf16.msra.mxu0 %v680_v5  ;;  %v695_v13 = vpack.c.bf16 %v204_v11, %v203_v10  ;;  %v218_v15 = vld [vmem:[#allocation2 + $0x68] sm:$0xff]  ;;  %v205_v16 = vld [vmem:[#allocation2 + $0x20] sm:$0xff]  ;;  %s715_s4 = smul.u32 24, %s194_s30  ;;  %v219_v20 = vld [vmem:[#allocation2 + $0x70] sm:$0xff]  ;;  %s476_s29 = sadd.s32 %s913_s15, %s591_s28 }
  0x3e   : > { %693 = vmatpush3.bf16.msra.mxu1 %v692_v9  ;;  %682 = vmatprep.subr.bf16.mxu0 %v934_v0  ;;  %v206_v17 = vld [vmem:[#allocation2 + $0x28] sm:$0xff]  ;;  %v686_v18 = vpack.c.bf16 %v218_v15, %v217_v14  ;;  %v220_v21 = vld [vmem:[#allocation2 + $0x78] sm:$0xff]  ;;  %v207_v22 = vld [vmem:[#allocation2 + $0x30] sm:$0xff]  ;;  %s592_s10 = sshll.u32 %s476_s29, 7  ;;  %s192_s30 = scalar_lea.vmem [#allocation5], %s579_s25 }
  0x3f   : > { %694 = vmatprep.subr.bf16.mxu1 %v934_v0  ;;  %v698_v19 = vpack.c.bf16 %v206_v17, %v205_v16  ;;  %v208_v23 = vld [vmem:[#allocation2 + $0x38] sm:$0xff]  ;;  %s197_s11 = scalar_lea.vmem %s1156_s0, %s715_s4  ;;  %v689_v24 = vpack.c.bf16 %v220_v21, %v219_v20  ;;  %v372_v26 = vld [vmem:[#allocation2 + $0x80] sm:$0xff]  ;;  %v373_v27 = vld [vmem:[#allocation2 + $0x88] sm:$0xff]  ;;  %s480_s4 = sshll.u32 %s192_s30, 4  ;;  %s1105_s4 = int_to_ptr.vmem [resolvable:$true] %s480_s4 }
  0x40   : > { %v701_v25 = vpack.c.bf16 %v208_v23, %v207_v22  ;;  %s199_s21 = scalar_lea.vmem %s197_s11, %s581_s20  ;;  %v704_v29 = vpack.c.bf16 %v373_v27, %v372_v26  ;;  %v374_v31 = vld [vmem:[#allocation2 + $0x90] sm:$0xff]  ;;  %v375_v32 = vld [vmem:[#allocation2 + $0x98] sm:$0xff]  ;;  %v376_v34 = vld [vmem:[#allocation2 + $0xa0] sm:$0xff]  ;;  %s1103_s11 = scalar_lea.hbm %s1159_s3, %s592_s10 }
  0x41   : > { %684 = vmatpush3.bf16.msra.mxu0 %v683_v12  ;;  %v583_v28 = vld [vmem:[%s199_s21 + $0x1] sm:$0xff]  ;;  %v707_v33 = vpack.c.bf16 %v375_v32, %v374_v31  ;;  %v377_v35 = vld [vmem:[#allocation2 + $0xa8] sm:$0xff]  ;;  %v589_v47 = vld [vmem:[%s1158_s2] ss:$0 sm:$0xff]  ;;  %s465_s15 = scalar_lea.sflag [#allocation4], %s190_s24  ;;  %s831_s16 = scalar_lea.vmem %s1105_s4, 128 }
  0x42   : > { %696 = vmatpush3.bf16.msra.mxu1 %v695_v13  ;;  %685 = vmatprep.subr.bf16.mxu0 %v934_v0  ;;  %v200_v30 = vld [vmem:[%s199_s21] sm:$0xff]  ;;  %v710_v36 = vpack.c.bf16 %v377_v35, %v376_v34  ;;  %v379_v38 = vld [vmem:[#allocation2 + $0xb8] sm:$0xff]  ;;  %p832_p8 = scmp.ne.s32.totalorder %s1105_s4, %s831_s16  ;;  %p1171_p10 = scmp.ne.s32.totalorder %s1164_s26, 0 }
  0x43   : > { %697 = vmatprep.subr.bf16.mxu1 %v934_v0  ;;  %v378_v37 = vld [vmem:[#allocation2 + $0xb0] sm:$0xff]  ;;  %s937_s20 = smov [#allocation5]  }
  0x44   : > { %v713_v39 = vpack.c.bf16 %v379_v38, %v378_v37  ;;  %v587_v40 = vld [vmem:[%s199_s21 + $0x2] sm:$0xff]  ;;  %p833_p12 = pnand %p832_p8, %p1171_p10  ;;  %s835_s21 = sshll.u32 %s937_s20, 4  ;;  %s836_s21 = int_to_ptr.vmem [resolvable:$false] %s835_s21 }
  0x45   : > { %687 = vmatpush3.bf16.msra.mxu0 %v686_v18  ;;  %s837_s25 = scalar_lea.vmem %s836_s21, 256  ;;  %p838_p2 = scmp.lt.s32.totalorder %s1105_s4, %s836_s21 }
  0x46   : > { %699 = vmatpush3.bf16.msra.mxu1 %v698_v19  ;;  %688 = vmatprep.subr.bf16.mxu0 %v934_v0  ;;  %p834_p0 = pneg %p833_p12  ;;  %p839_p5 = scmp.lt.s32.totalorder %s837_s25, %s831_s16 }
  0x47   : > { %700 = vmatprep.subr.bf16.mxu1 %v934_v0 }
  0x48   : > { %p840_p6 = por %p839_p5, %p838_p2 }
  0x49   : > { %690 = vmatpush3.bf16.msra.mxu0 %v689_v24 }
  0x4a   : > { %702 = vmatpush3.bf16.msra.mxu1 %v701_v25  ;;  %703 = vmatprep.subr.bf16.mxu0 %v934_v0  ;;  %p841_p7 = pnand %p840_p6, %p834_p0 }
  0x4c   : > { %639 = vmatmul.mubr.msk.f32.vlgmr.msra.gmra.mrb[0].mxu0 %vm221_vm1, %v583_v28 }
  0x4d   : > { %658 = vmatmul.mubr.msk.f32.vlgmr.msra.gmra.mrb[0].mxu1 %vm221_vm1, %v200_v30  ;;  %705 = vmatpush3.bf16.msra.mxu0 %v704_v29 }
  0x4e   : > { %706 = vmatprep.subr.bf16.mxu0 %v934_v0  ;;  %676 = vmatprep.mubr.msk.f32.mxu0 %vm935_vm0, %v936_v1 }
  0x51   : > { %708 = vmatpush3.bf16.msra.mxu0 %v707_v33 }
  0x52   : > { %709 = vmatprep.subr.bf16.mxu0 %v934_v0 }
  0x55   : > { %711 = vmatpush3.bf16.msra.mxu0 %v710_v36 }
  0x56   : > { %712 = vmatprep.subr.bf16.mxu0 %v934_v0 }
  0x59   : > { %714 = vmatpush3.bf16.msra.mxu0 %v713_v39 }
  0x5c   : > { %677 = vmatmul.mubr.msk.f32.vlgmr.msra.gmra.mrb[2].mxu0 %vm221_vm1, %v587_v40 }
 0x11f   : > { %v291_v41 = vpop.f32.mrb[0].mxu0 }
 0x120   : > { %v640_v42 = vpop.f32.mrb[1].mxu0  ;;  %v364_v43 = vpop.f32.mrb[0].mxu1 }
 0x121   : > { %v365_v44 = vadd.f32 %v364_v43, %v291_v41  ;;  %v659_v45 = vpop.f32.mrb[1].mxu1 }
 0x12f   : > { %v449_v46 = vpop.f32.mrb[2].mxu0 }
 0x130   : > { %v453_v48 = vadd.f32 %v449_v46, %v365_v44  ;;  %v678_v49 = vpop.f32.mrb[3].mxu0 }
 0x132   : > { %v461_v50 = vadd.f32 %v589_v47, %v453_v48 }
 0x134   : > { %v462_v51 = vmax.f32 %v461_v50, 0.0 }
 0x136   : > { %463 = vst [vmem:[%s192_s30] sm:$0xff] %v462_v51 }
 0x137   : > { %844 = shalt.err (!%p841_p7)
}
 0x138   : > { %s845_s24 = scalar_lea.hbm %s1103_s11, 128  ;;  %s849_s6 = scalar_lea.hbm %s1159_s3, 512 }
 0x139   : > { %p846_p9 = scmp.ne.s32.totalorder %s1103_s11, %s845_s24  ;;  %p850_p1 = scmp.lt.u32.totalorder %s1103_s11, %s1159_s3 }
 0x13a   : > { %p851_p4 = scmp.lt.u32.totalorder %s849_s6, %s845_s24  ;;  %p853_p8 = scmp.lt.u32.totalorder %s845_s24, %s1103_s11 }
 0x13b   : > { %p847_p11 = pnand %p846_p9, %p1171_p10 }
 0x13c   : > { %p852_p3 = por %p851_p4, %p850_p1 }
 0x13d   : > { %p848_p13 = pneg %p847_p11 }
 0x13e   : > { %p854_p12 = por %p853_p8, %p852_p3 }
 0x140   : > { %p855_p0 = pnand %p854_p12, %p848_p13 }
 0x142   : > { %858 = shalt.err (!%p855_p0)
}
 0x143   : > { %720 = dma.vmem_to_hbm [thread:$0]  (%p1171_p10), %s1105_s4, 128, %s1103_s11, %s465_s15  }
 0x144 PF: > { %p732_p2 = scmp.ge.s32.totalorder %s929_s19, 2  ;;  %s492_s30 = sand.u32 1, %s901_s12  }
 0x145   : > { %p1172_p5 = scmp.ne.s32.totalorder %s1165_s27, 0  ;;  %s493_s7 = scalar_lea.sflag [#allocation4], %s492_s30 }
 0x147   : > { %p727_p6 = pnand %p732_p2, %p1172_p5 }
 0x149   : > { %896 = dma.done.wait (!%p727_p6), %s493_s7, 128  }
 0x14a   : > { %898 = vsyncadd (!%p727_p6), %s493_s7, 4294967168  ;;  %s17_s19 = sadd.s32 1, %s929_s19   ;;  %s1173_s12 = smov %s905_s13 }
 0x14b   : > { %p14_p7 = scmp.ge.s32.totalorder %s17_s19, 6   ;;  %s1174_s13 = smov %s909_s14 }
 0x14c   : > { %s1175_s14 = smov %s1037_s5  ;;  %s1176_s15 = smov %s921_s17 }
 0x14d   : > { %s1177_s16 = smov %s925_s18  ;;  %s1178_s17 = smov %s1181_s22 }
 0x14e   : > { %s1179_s18 = smov %s1185_s23  ;;  %16 = sbr.rel (!%p14_p7) target bundleno = 6 (0x6), region = 77 }
 0x155   :  { %498 = vsyncpa [#allocation3], 1 }
 0x156   :  { %500 = vsyncpa [#allocation3 + $0x1], 1 }
 0x157   :  { %501 = vsyncpa [#allocation4], 1 }
 0x158   :  { %503 = vsyncpa [#allocation4 + $0x1], 1 }

</bundles_post_ra>
